<compile_context>
chip_gen: v7x
topology: tpu7x:2x2x1
jax: 0.10.0
libtpu: 0.0.40
codegen_flags: <defaults>
</compile_context>

<pallas_src>
import functools

import jax
import jax.numpy as jnp
from jax.experimental import pallas as pl
from jax.experimental.pallas import tpu as pltpu

# ----------------------------- problem sizes --------------------------------
B = 2          # batch
S = 8          # seq_length
E = 32         # embed_dim
H = 4          # num_heads
D = E // H     # head_dim (shared K/V dimension in MQA)


# ------------------------------ Pallas kernel -------------------------------
def mqa_kernel(x_ref, wqkv_ref, bqkv_ref, wo_ref, bo_ref, o_ref, *,
               batch, seq, embed_dim, num_heads):
    head_dim = embed_dim // num_heads
    x = x_ref[...]                                              # (B*S, E)

    # Fused Q/K/V projection: one MXU push.  The 1/sqrt(embed_dim) attention
    # scale is already folded into the Q columns of wqkv/bqkv.
    qkv = jnp.dot(x, wqkv_ref[...],
                  preferred_element_type=jnp.float32) + bqkv_ref[...]  # (B*S, E+2D)

    q = qkv[:, :embed_dim].reshape(batch, seq, embed_dim)               # (B, S, E)
    k = qkv[:, embed_dim:embed_dim + head_dim].reshape(batch, seq, head_dim)
    v = qkv[:, embed_dim + head_dim:].reshape(batch, seq, head_dim)     # (B, S, D)

    # Head-stack Q along the sublane (row) axis -> (B, H*S, D) so all heads'
    # scores come from ONE batched matmul (K/V are shared across heads: MQA).
    q_hm = jnp.concatenate(
        [q[:, :, h * head_dim:(h + 1) * head_dim] for h in range(num_heads)],
        axis=1)                                                         # (B, H*S, D)

    scores = jnp.einsum('bnd,bkd->bnk', q_hm, k,
                        preferred_element_type=jnp.float32)             # (B, H*S, S)
    scores = scores - jnp.max(scores, axis=-1, keepdims=True)
    p = jnp.exp(scores)
    p = p * pl.reciprocal(jnp.sum(p, axis=-1, keepdims=True), approx=True)
    o_hm = jnp.einsum('bnk,bkd->bnd', p, v,
                      preferred_element_type=jnp.float32)               # (B, H*S, D)

    # Un-stack heads back to the (B, S, H*D) lane layout for the out-projection
    # (sublane slices are tile-aligned since seq == 8; one lane-concat total).
    attn = jnp.concatenate(
        [o_hm[:, h * seq:(h + 1) * seq, :] for h in range(num_heads)],
        axis=2)                                                         # (B, S, E)
    attn = attn.reshape(batch * seq, embed_dim)

    out = jnp.dot(attn, wo_ref[...],
                  preferred_element_type=jnp.float32) + bo_ref[...]     # (B*S, E)
    o_ref[...] = out.astype(o_ref.dtype)


# ------------------------ parameter packing (one-time) ----------------------
def pack_params(params, *, embed_dim):
    """Fuse Q/K/V weights into one matrix and fold in the 1/sqrt(E) scale."""
    scale = 1.0 / (embed_dim ** 0.5)
    wqkv_t = jnp.concatenate(
        [params["wq_t"] * scale, params["wk_t"], params["wv_t"]], axis=1)  # (E, E+2D)
    bqkv = jnp.concatenate(
        [params["bq"] * scale, params["bk"], params["bv"]], axis=1)        # (1, E+2D)
    return {"wqkv_t": wqkv_t, "bqkv": bqkv,
            "wo_t": params["wo_t"], "bo": params["bo"]}


# ------------------------------- wrapper -------------------------------------
def multi_query_attention(x, packed, *, embed_dim, num_heads):
    """x: (B, S, E) float32.  packed: output of pack_params()."""
    b, s, e = x.shape
    assert e == embed_dim
    x2d = x.reshape(b * s, e)                      # free metadata reshape in HBM

    kernel = functools.partial(mqa_kernel, batch=b, seq=s,
                               embed_dim=embed_dim, num_heads=num_heads)

    def vmem():
        return pl.BlockSpec(memory_space=pltpu.MemorySpace.VMEM)

    # Whole problem fits comfortably in VMEM -> single invocation, no grid.
    out2d = pl.pallas_call(
        kernel,
        out_shape=jax.ShapeDtypeStruct((b * s, e), jnp.float32),
        in_specs=[vmem(), vmem(), vmem(), vmem(), vmem()],
        out_specs=vmem(),
    )(x2d, packed["wqkv_t"], packed["bqkv"], packed["wo_t"], packed["bo"])
    return out2d.reshape(b, s, e)


# --------------------------- pure-JAX reference ------------------------------
def reference_mqa(x, params, *, embed_dim, num_heads):
    d = embed_dim // num_heads
    bsz, s, _ = x.shape
    q = x @ params["wq_t"] + params["bq"][0]            # (B, S, E)
    k = x @ params["wk_t"] + params["bk"][0]            # (B, S, D)
    v = x @ params["wv_t"] + params["bv"][0]            # (B, S, D)
    q = q.reshape(bsz, s, num_heads, d)
    scores = jnp.einsum("bqhd,bkd->bhqk", q, k) / (embed_dim ** 0.5)
    w = jax.nn.softmax(scores, axis=-1)
    attn = jnp.einsum("bhqk,bkd->bqhd", w, v).reshape(bsz, s, embed_dim)
    return attn @ params["wo_t"] + params["bo"][0]


# --------------------------------- main --------------------------------------
def make_params(key):
    ks = jax.random.split(key, 8)
    sc = 0.05
    return {
        # stored pre-transposed: (in_features, out_features)
        "wq_t": sc * jax.random.normal(ks[0], (E, E), jnp.float32),
        "bq":   sc * jax.random.normal(ks[1], (1, E), jnp.float32),
        "wk_t": sc * jax.random.normal(ks[2], (E, D), jnp.float32),
        "bk":   sc * jax.random.normal(ks[3], (1, D), jnp.float32),
        "wv_t": sc * jax.random.normal(ks[4], (E, D), jnp.float32),
        "bv":   sc * jax.random.normal(ks[5], (1, D), jnp.float32),
        "wo_t": sc * jax.random.normal(ks[6], (E, E), jnp.float32),
        "bo":   sc * jax.random.normal(ks[7], (1, E), jnp.float32),
    }


if __name__ == "__main__":
    key = jax.random.PRNGKey(0)
    kx, kp = jax.random.split(key)
    x = jax.random.normal(kx, (B, S, E), jnp.float32)
    params = make_params(kp)
    packed = pack_params(params, embed_dim=E)   # one-time constant fold

    out = jax.block_until_ready(
        multi_query_attention(x, packed, embed_dim=E, num_heads=H))
    ref = jax.block_until_ready(
        reference_mqa(x, params, embed_dim=E, num_heads=H))

    assert out.shape == (B, S, E)
    # Tolerance loosened slightly because the softmax denominator uses the
    # approximate EUP reciprocal.
    assert jnp.allclose(out, ref, rtol=1e-2, atol=1e-3), \
        f"max abs err {jnp.max(jnp.abs(out - ref))}"

    print("KERNEL_OK")
</pallas_src>

<mosaic_0001>
module attributes {stable_mosaic.version = 11 : i64} {
  func.func @mqa_kernel(%arg0: memref<16x32xf32, #tpu.memory_space<vmem>>, %arg1: memref<32x48xf32, #tpu.memory_space<vmem>>, %arg2: memref<1x48xf32, #tpu.memory_space<vmem>>, %arg3: memref<32x32xf32, #tpu.memory_space<vmem>>, %arg4: memref<1x32xf32, #tpu.memory_space<vmem>>, %arg5: memref<16x32xf32, #tpu.memory_space<vmem>>) attributes {dimension_semantics = [], scalar_prefetch = 0 : i64, scratch_operands = 0 : i64, tpu.core_type = #tpu.core_type<tc>} {
    %c0 = arith.constant 0 : index
    %c0_0 = arith.constant 0 : index
    %0 = vector.load %arg0[%c0, %c0_0] : memref<16x32xf32, #tpu.memory_space<vmem>>, vector<16x32xf32>
    %c0_1 = arith.constant 0 : index
    %c0_2 = arith.constant 0 : index
    %1 = vector.load %arg1[%c0_1, %c0_2] : memref<32x48xf32, #tpu.memory_space<vmem>>, vector<32x48xf32>
    %cst = arith.constant dense<0.000000e+00> : vector<16x48xf32>
    %2 = tpu.matmul %0, %1, %cst {dimension_numbers = #tpu.dot_dimension_numbers<[1], [0], [0], [1], [0, 0, 1, 1], [], []>} : vector<16x32xf32>, vector<32x48xf32>, vector<16x48xf32> -> vector<16x48xf32>
    %c0_3 = arith.constant 0 : index
    %c0_4 = arith.constant 0 : index
    %3 = vector.load %arg2[%c0_3, %c0_4] : memref<1x48xf32, #tpu.memory_space<vmem>>, vector<1x48xf32>
    %4 = vector.broadcast %3 : vector<1x48xf32> to vector<16x48xf32>
    %5 = arith.addf %2, %4 : vector<16x48xf32>
    %6 = vector.extract_strided_slice %5 {offsets = [0, 0], sizes = [16, 32], strides = [1, 1]} : vector<16x48xf32> to vector<16x32xf32>
    %7 = vector.shape_cast %6 : vector<16x32xf32> to vector<2x8x32xf32>
    %8 = vector.extract_strided_slice %5 {offsets = [0, 32], sizes = [16, 8], strides = [1, 1]} : vector<16x48xf32> to vector<16x8xf32>
    %9 = vector.shape_cast %8 : vector<16x8xf32> to vector<2x8x8xf32>
    %10 = vector.extract_strided_slice %5 {offsets = [0, 40], sizes = [16, 8], strides = [1, 1]} : vector<16x48xf32> to vector<16x8xf32>
    %11 = vector.shape_cast %10 : vector<16x8xf32> to vector<2x8x8xf32>
    %12 = vector.extract_strided_slice %7 {offsets = [0, 0, 0], sizes = [2, 8, 8], strides = [1, 1, 1]} : vector<2x8x32xf32> to vector<2x8x8xf32>
    %13 = vector.extract_strided_slice %7 {offsets = [0, 0, 8], sizes = [2, 8, 8], strides = [1, 1, 1]} : vector<2x8x32xf32> to vector<2x8x8xf32>
    %14 = vector.extract_strided_slice %7 {offsets = [0, 0, 16], sizes = [2, 8, 8], strides = [1, 1, 1]} : vector<2x8x32xf32> to vector<2x8x8xf32>
    %15 = vector.extract_strided_slice %7 {offsets = [0, 0, 24], sizes = [2, 8, 8], strides = [1, 1, 1]} : vector<2x8x32xf32> to vector<2x8x8xf32>
    %16 = tpu.concatenate %12, %13, %14, %15 in 1 : vector<2x8x8xf32>, vector<2x8x8xf32>, vector<2x8x8xf32>, vector<2x8x8xf32> -> vector<2x32x8xf32>
    "tpu.trace_start"() <{level = 10 : i32, message = "bnd,bkd->bnk"}> : () -> ()
    %cst_5 = arith.constant dense<0.000000e+00> : vector<2x32x8xf32>
    %17 = tpu.matmul %16, %9, %cst_5 {dimension_numbers = #tpu.dot_dimension_numbers<[2], [2], [1], [1], [0, 0, 0, 1, 1, 1], [0], [0]>} : vector<2x32x8xf32>, vector<2x8x8xf32>, vector<2x32x8xf32> -> vector<2x32x8xf32>
    "tpu.trace_stop"() : () -> ()
    %cst_6 = arith.constant dense<0xFF800000> : vector<2x32xf32>
    %18 = vector.multi_reduction <maximumf>, %17, %cst_6 [2] : vector<2x32x8xf32> to vector<2x32xf32>
    %19 = vector.shape_cast %18 : vector<2x32xf32> to vector<2x32x1xf32>
    %20 = vector.broadcast %19 : vector<2x32x1xf32> to vector<2x32x8xf32>
    %21 = arith.subf %17, %20 : vector<2x32x8xf32>
    %22 = math.exp %21 : vector<2x32x8xf32>
    %cst_7 = arith.constant dense<0.000000e+00> : vector<2x32xf32>
    %23 = vector.multi_reduction <add>, %22, %cst_7 [2] : vector<2x32x8xf32> to vector<2x32xf32>
    %24 = vector.shape_cast %23 : vector<2x32xf32> to vector<2x32x1xf32>
    %25 = tpu.reciprocal %24 {approx = true} : vector<2x32x1xf32> -> vector<2x32x1xf32>
    %26 = vector.broadcast %25 : vector<2x32x1xf32> to vector<2x32x8xf32>
    %27 = arith.mulf %22, %26 : vector<2x32x8xf32>
    "tpu.trace_start"() <{level = 10 : i32, message = "bnk,bkd->bnd"}> : () -> ()
    %cst_8 = arith.constant dense<0.000000e+00> : vector<2x32x8xf32>
    %28 = tpu.matmul %27, %11, %cst_8 {dimension_numbers = #tpu.dot_dimension_numbers<[2], [1], [1], [2], [0, 0, 0, 1, 1, 2], [0], [0]>} : vector<2x32x8xf32>, vector<2x8x8xf32>, vector<2x32x8xf32> -> vector<2x32x8xf32>
    "tpu.trace_stop"() : () -> ()
    %29 = vector.extract_strided_slice %28 {offsets = [0, 0, 0], sizes = [2, 8, 8], strides = [1, 1, 1]} : vector<2x32x8xf32> to vector<2x8x8xf32>
    %30 = vector.extract_strided_slice %28 {offsets = [0, 8, 0], sizes = [2, 8, 8], strides = [1, 1, 1]} : vector<2x32x8xf32> to vector<2x8x8xf32>
    %31 = vector.extract_strided_slice %28 {offsets = [0, 16, 0], sizes = [2, 8, 8], strides = [1, 1, 1]} : vector<2x32x8xf32> to vector<2x8x8xf32>
    %32 = vector.extract_strided_slice %28 {offsets = [0, 24, 0], sizes = [2, 8, 8], strides = [1, 1, 1]} : vector<2x32x8xf32> to vector<2x8x8xf32>
    %33 = tpu.concatenate %29, %30, %31, %32 in 2 : vector<2x8x8xf32>, vector<2x8x8xf32>, vector<2x8x8xf32>, vector<2x8x8xf32> -> vector<2x8x32xf32>
    %34 = vector.shape_cast %33 : vector<2x8x32xf32> to vector<16x32xf32>
    %c0_9 = arith.constant 0 : index
    %c0_10 = arith.constant 0 : index
    %35 = vector.load %arg3[%c0_9, %c0_10] : memref<32x32xf32, #tpu.memory_space<vmem>>, vector<32x32xf32>
    %cst_11 = arith.constant dense<0.000000e+00> : vector<16x32xf32>
    %36 = tpu.matmul %34, %35, %cst_11 {dimension_numbers = #tpu.dot_dimension_numbers<[1], [0], [0], [1], [0, 0, 1, 1], [], []>} : vector<16x32xf32>, vector<32x32xf32>, vector<16x32xf32> -> vector<16x32xf32>
    %c0_12 = arith.constant 0 : index
    %c0_13 = arith.constant 0 : index
    %37 = vector.load %arg4[%c0_12, %c0_13] : memref<1x32xf32, #tpu.memory_space<vmem>>, vector<1x32xf32>
    %38 = vector.broadcast %37 : vector<1x32xf32> to vector<16x32xf32>
    %39 = arith.addf %36, %38 : vector<16x32xf32>
    %c0_14 = arith.constant 0 : index
    %c0_15 = arith.constant 0 : index
    %40 = vector.load %arg5[%c0_14, %c0_15] : memref<16x32xf32, #tpu.memory_space<vmem>>, vector<16x32xf32>
    tpu.vector_store %arg5[%c0_14, %c0_15], %39 {strides = array<i32>} : memref<16x32xf32, #tpu.memory_space<vmem>>, vector<16x32xf32>,
    return
  }
}

</mosaic_0001>

<bundles_post_ra>
// kernel: tpu_custom_call.1
= control target key start
LH: loop header
LB: loop body
LE: loop exit
PB: predicated region body
PF: predicated region fallthrough
CT: control target
= control target key end

     0   :  { %10 = vsyncpa [#allocation3], 0  ;;  %s1245_s0 = inlined_call_operand.hbm [shape: f32[16,32], index: 0, kind: input, shape index: {}]   ;;  %s1246_s1 = inlined_call_operand.hbm [shape: f32[32,48], index: 1, kind: input, shape index: {}]   ;;  %s1247_s2 = inlined_call_operand.vmem [shape: f32[1,48], index: 2, kind: input, shape index: {}]   ;;  %s1248_s3 = inlined_call_operand.hbm [shape: f32[32,32], index: 3, kind: input, shape index: {}]   ;;  %s1249_s4 = inlined_call_operand.vmem [shape: f32[1,32], index: 4, kind: input, shape index: {}]   ;;  %s1250_s5 = inlined_call_operand.hbm [shape: f32[16,32], index: 5, kind: output, shape index: {}]  }
   0x1   :  { %11 = vsyncpa [#allocation6], 0 }
   0x2   :  { %12 = vsyncpa [#allocation4], 0  ;;  %s1063_s18 = smov [#allocation5]   ;;  %s1064_s20 = smov [#allocation2]  }
   0x3   :  { %s30_s19 = sshll.u32 %s1063_s18, 4  ;;  %s18_s21 = sshll.u32 %s1064_s20, 4  ;;  %s31_s19 = int_to_ptr.vmem [resolvable:$true] %s30_s19  ;;  %s1106_s21 = int_to_ptr.vmem [resolvable:$true] %s18_s21 }
   0x4   :  { %s969_s24 = scalar_lea.hbm %s1246_s1, 512 }
   0x5   :  { %p970_p0 = scmp.ne.s32.totalorder %s1246_s1, %s969_s24  ;;  %p973_p1 = scmp.lt.u32.totalorder %s969_s24, %s1246_s1 }
   0x7   :  { %p975_p2 = pnand %p973_p1, %p970_p0 }
   0x9   :  { %978 = shalt.err (!%p975_p2)
}
   0xa   :  { %s979_s29 = scalar_lea.vmem %s31_s19, 512  ;;  %p984_p4 = scmp.lt.s32.totalorder %s31_s19, %s31_s19 }
   0xb   :  { %p980_p3 = scmp.ne.s32.totalorder %s31_s19, %s979_s29  ;;  %p985_p5 = scmp.lt.s32.totalorder %s979_s29, %s979_s29 }
   0xd   :  { %p986_p6 = por %p985_p5, %p984_p4 }
   0xf   :  { %p987_p7 = pnand %p986_p6, %p980_p3 }
  0x11   :  { %990 = shalt.err (!%p987_p7)
}
  0x12   :  { %s1065_s30 = smov 128   ;;  %s1066_s6 = smov 8  }
  0x13   :  { %36 = dma.hbm_to_vmem [thread:$0]  %s1246_s1, 512, %s31_s19, [#allocation6], %s1065_s30, %s1065_s30, %s1066_s6  }
  0x14   :  { %s991_s11 = scalar_lea.hbm %s1245_s0, 256 }
  0x15   :  { %p992_p8 = scmp.ne.s32.totalorder %s1245_s0, %s991_s11  ;;  %p995_p9 = scmp.lt.u32.totalorder %s991_s11, %s1245_s0 }
  0x17   :  { %p997_p10 = pnand %p995_p9, %p992_p8 }
  0x19   :  { %1000 = shalt.err (!%p997_p10)
}
  0x1a   :  { %s1001_s16 = scalar_lea.vmem %s1106_s21, 256  ;;  %p1006_p12 = scmp.lt.s32.totalorder %s1106_s21, %s1106_s21 }
  0x1b   :  { %p1002_p11 = scmp.ne.s32.totalorder %s1106_s21, %s1001_s16  ;;  %p1007_p13 = scmp.lt.s32.totalorder %s1001_s16, %s1001_s16 }
  0x1d   :  { %p1008_p0 = por %p1007_p13, %p1006_p12 }
  0x1f   :  { %p1009_p1 = pnand %p1008_p0, %p1002_p11 }
  0x21   :  { %1012 = shalt.err (!%p1009_p1)
}
  0x22   :  { %24 = dma.hbm_to_vmem [thread:$0]  %s1245_s0, 256, %s1106_s21, [#allocation3], %s1065_s30, %s1065_s30, %s1066_s6  }
  0x23   :  { %s1067_s18 = smov [#allocation7]   ;;  %s1013_s23 = scalar_lea.hbm %s1248_s3, 512 }
  0x24   :  { %s44_s19 = sshll.u32 %s1067_s18, 4  ;;  %p1014_p2 = scmp.ne.s32.totalorder %s1248_s3, %s1013_s23  ;;  %s45_s19 = int_to_ptr.vmem [resolvable:$true] %s44_s19 }
  0x25   :  { %p1017_p3 = scmp.lt.u32.totalorder %s1013_s23, %s1248_s3 }
  0x27   :  { %p1019_p4 = pnand %p1017_p3, %p1014_p2 }
  0x29   :  { %1022 = shalt.err (!%p1019_p4)
}
  0x2a   :  { %s1023_s28 = scalar_lea.vmem %s45_s19, 512  ;;  %p1028_p6 = scmp.lt.s32.totalorder %s45_s19, %s45_s19 }
  0x2b   :  { %p1024_p5 = scmp.ne.s32.totalorder %s45_s19, %s1023_s28  ;;  %p1029_p7 = scmp.lt.s32.totalorder %s1023_s28, %s1023_s28 }
  0x2d   :  { %p1030_p8 = por %p1029_p7, %p1028_p6 }
  0x2f   :  { %p1031_p9 = pnand %p1030_p8, %p1024_p5 }
  0x31   :  { %1034 = shalt.err (!%p1031_p9)
}
  0x32   :  { %50 = dma.hbm_to_vmem [thread:$0]  %s1248_s3, 512, %s45_s19, [#allocation6], %s1065_s30, %s1065_s30, %s1066_s6  }
  0x33   :  { %1057 = dma.done.wait [#allocation3], 256  }
  0x34   :  { %1058 = vsyncadd [#allocation3], 4294967040 }
  0x35   :  { %1059 = dma.done.wait [#allocation6], 1024  }
  0x36   :  { %1060 = vsyncadd [#allocation6], 4294966272  ;;  %vm75_vm0 = vcmask 261120   ;;  %v64_v0 = vld [vmem:[#allocation5] sm:$0xff]  ;;  %v65_v1 = vld [vmem:[#allocation5 + $0x8] sm:$0xff]  ;;  %vm173_vm1 = vcmask 64512  }
  0x37   :  { %v66_v2 = vld [vmem:[#allocation5 + $0x10] sm:$0xff]  ;;  %v908_v3 = vpack.c.bf16 %v65_v1, %v64_v0  ;;  %v67_v4 = vld [vmem:[#allocation5 + $0x18] sm:$0xff]  ;;  %s1068_s7 = smov 120   ;;  %s1069_s8 = smov 96   ;;  %vm680_vm2 = vcmask 130048   ;;  %vm683_vm3 = vcmask 195584  }
  0x38   :  { %v62_v5 = vld [vmem:[#allocation2] sm:$0xff]  ;;  %v912_v6 = vpack.c.bf16 %v67_v4, %v66_v2  ;;  %v63_v7 = vld [vmem:[#allocation2 + $0x8] sm:$0xff]  ;;  %s1071_s9 = smov 104   ;;  %s1072_s10 = smov 88  }
  0x39   :  { %862 = vmatprep.mubr.msk.f32.mxu0 %vm75_vm0, %v62_v5  ;;  %909 = vmatprep.subr.bf16.mxu0 %v908_v3  ;;  %v798_v8 = vld [vmem:[%s1247_s2] ss:$0 sm:$0xff]  ;;  %s1070_s2 = smov 112   ;;  %s1073_s11 = smov 16  }
  0x3a   :  { %911 = vmatpush3.bf16.msra.mxu0 %v908_v3  ;;  %s1074_s12 = smov 24   ;;  %s1075_s15 = smov [#allocation8]  }
  0x3b   :  { %913 = vmatprep.subr.bf16.mxu0 %v912_v6  ;;  %s785_s16 = sshll.u32 %s1075_s15, 4  ;;  %s786_s16 = int_to_ptr.vmem [resolvable:$true] %s785_s16 }
  0x3c   :  { %s1035_s1 = scalar_lea.vmem %s786_s16, 256  ;;  %p1040_p11 = scmp.lt.s32.totalorder %s786_s16, %s786_s16 }
  0x3d   :  { %p1036_p10 = scmp.ne.s32.totalorder %s786_s16, %s1035_s1  ;;  %p1041_p12 = scmp.lt.s32.totalorder %s1035_s1, %s1035_s1 }
  0x3e   :  { %915 = vmatpush3.bf16.msra.mxu0 %v912_v6 }
  0x3f   :  { %p1042_p13 = por %p1041_p12, %p1040_p11 }
  0x41   :  { %863 = vmatmul.mubr.msk.f32.vlgmr.msra.gmra.mrb[0].mxu0 %vm75_vm0, %v63_v7  ;;  %p1043_p0 = pnand %p1042_p13, %p1036_p10 }
 0x114   :  { %v864_v9 = vpop.f32.mrb[0].mxu0 }
 0x115   :  { %v1163_v10 = vadd.f32 %v864_v9, %v798_v8  ;;  %v148_v11 = vpop.f32.mrb[1].mxu0 }
 0x116   :  { %v1165_v12 = vadd.f32 %v798_v8, %v148_v11 }
 0x117   :  { %161 = vrot.lane.b32.xlu1 %v1163_v10, %s1068_s7  ;;  %269 = vrot.lane.b32.xlu0 %v1163_v10, %s1069_s8 }
 0x118   :  { %875 = vmatprep.mubr.msk.f32.mxu0 %vm173_vm1, %v1163_v10  ;;  %867 = vmatprep.mubr.msk.f32.mxu1 %vm173_vm1, %v1165_v12 }
 0x11b   :  { %159 = vrot.lane.b32.xlu1 %v1165_v12, %s1068_s7  ;;  %171 = vrot.lane.b32.xlu0 %v1165_v12, %s1069_s8 }
 0x11f   :  { %165 = vrot.lane.b32.xlu1 %v1163_v10, %s1070_s2  ;;  %163 = vrot.lane.b32.xlu0 %v1165_v12, %s1070_s2 }
 0x123   :  { %169 = vrot.lane.b32.xlu1 %v1163_v10, %s1071_s9  ;;  %167 = vrot.lane.b32.xlu0 %v1165_v12, %s1071_s9 }
 0x189   :  { %v162_v13 = vpop.permute.xlu1 %161  ;;  %v270_v14 = vpop.permute.xlu0 %269 }
 0x18a   :  { %873 = vmatprep.subr.msk.mxu0 %vm173_vm1, %v270_v14 }
 0x18b   :  { %874 = vmatpush3.xpose.msk.msra.mxu0 %vm173_vm1, %v270_v14 }
 0x18d   :  { %v160_v15 = vpop.permute.xlu1 %159  ;;  %v172_v16 = vpop.permute.xlu0 %171 }
 0x18e   :  { %865 = vmatprep.subr.msk.mxu1 %vm173_vm1, %v172_v16  ;;  %876 = vmatmul.mubr.msk.f32.vlgmr.msra.gmra.mrb[2].mxu0 %vm173_vm1, %v162_v13 }
 0x18f   :  { %866 = vmatpush3.xpose.msk.msra.mxu1 %vm173_vm1, %v172_v16 }
 0x191   :  { %v166_v17 = vpop.permute.xlu1 %165  ;;  %v164_v18 = vpop.permute.xlu0 %163 }
 0x192   :  { %868 = vmatmul.mubr.msk.f32.vlgmr.msra.gmra.mrb[0].mxu1 %vm173_vm1, %v160_v15  ;;  %878 = vmatprep.mubr.msk.f32.mxu0 %vm173_vm1, %v166_v17 }
 0x193   :  { %870 = vmatprep.mubr.msk.f32.mxu1 %vm173_vm1, %v164_v18 }
 0x195   :  { %v170_v19 = vpop.permute.xlu1 %169  ;;  %v168_v20 = vpop.permute.xlu0 %167 }
 0x196   :  { %871 = vmatmul.mubr.msk.f32.gmra.mrb[2].mxu1 %vm173_vm1, %v168_v20  ;;  %879 = vmatmul.mubr.msk.f32.gmra.mrb[4].mxu0 %vm173_vm1, %v170_v19 }
 0x261   :  { %v877_v21 = vpop.f32.mrb[2].mxu0 }
 0x262   :  { %v347_v22 = vpop.f32.mrb[3].mxu0  ;;  %v381_v23 = vsel %vm173_vm1, %v877_v21, -inf }
 0x263   :  { %382 = vmax.xlane.f32.xlu0 %v381_v23  ;;  %v378_v26 = vsel %vm173_vm1, %v347_v22, -inf }
 0x265   :  { %v869_v24 = vpop.f32.mrb[0].mxu1 }
 0x266   :  { %v250_v25 = vpop.f32.mrb[1].mxu1  ;;  %v369_v27 = vsel %vm173_vm1, %v869_v24, -inf }
 0x267   :  { %379 = vmax.xlane.f32.xlu0 %v378_v26  ;;  %370 = vmax.xlane.f32.xlu1 %v369_v27  ;;  %v366_v32 = vsel %vm173_vm1, %v250_v25, -inf }
 0x269   :  { %v872_v28 = vpop.f32.mrb[2].mxu1  ;;  %v880_v29 = vpop.f32.mrb[4].mxu0 }
 0x26a   :  { %v260_v30 = vpop.f32.mrb[3].mxu1  ;;  %v357_v31 = vpop.f32.mrb[5].mxu0  ;;  %v375_v34 = vsel %vm173_vm1, %v872_v28, -inf  ;;  %v387_v36 = vsel %vm173_vm1, %v880_v29, -inf }
 0x26b   :  { %367 = vmax.xlane.f32.xlu0 %v366_v32  ;;  %v372_v33 = vsel %vm173_vm1, %v260_v30, -inf  ;;  %v384_v35 = vsel %vm173_vm1, %v357_v31, -inf }
 0x26c   :  { %373 = vmax.xlane.f32.xlu1 %v372_v33 }
 0x26f   :  { %376 = vmax.xlane.f32.xlu0 %v375_v34 }
 0x270   :  { %385 = vmax.xlane.f32.xlu1 %v384_v35 }
 0x273   :  { %388 = vmax.xlane.f32.xlu0 %v387_v36 }
 0x2f0   :  { %v383_v37 = vpop.xlane.xlu0 %382 }
 0x2f1   :  { %v395_v38 = vsub.f32 %v877_v21, %v383_v37 }
 0x2f3   :  { %v408_v39 = vmul.f32 1.442695, %v395_v38 }
 0x2f4   :  { %v380_v40 = vpop.xlane.xlu0 %379  ;;  %v371_v41 = vpop.xlane.xlu1 %370 }
 0x2f5   :  { %937 = vpow2.f32 %v408_v39  ;;  %v394_v42 = vsub.f32 %v347_v22, %v380_v40  ;;  %v391_v43 = vsub.f32 %v869_v24, %v371_v41  ;;  %v686_v39 = vld [vmem:[#allocation7] sm:$0xff]  ;;  %v687_v40 = vld [vmem:[#allocation7 + $0x8] sm:$0xff] }
 0x2f6   :  { %v916_v41 = vpack.c.bf16 %v687_v40, %v686_v39 }
 0x2f7   :  { %v406_v44 = vmul.f32 1.442695, %v394_v42  ;;  %v400_v45 = vmul.f32 1.442695, %v391_v43  ;;  %v688_v42 = vld [vmem:[#allocation7 + $0x10] sm:$0xff]  ;;  %v689_v43 = vld [vmem:[#allocation7 + $0x18] sm:$0xff] }
 0x2f8   :  { %v368_v46 = vpop.xlane.xlu0 %367 }
 0x2f9   :  { %939 = vpow2.f32 %v406_v44  ;;  %v390_v47 = vsub.f32 %v250_v25, %v368_v46  ;;  %v374_v48 = vpop.xlane.xlu1 %373 }
 0x2fa   :  { %941 = vpow2.f32 %v400_v45  ;;  %v392_v50 = vsub.f32 %v260_v30, %v374_v48  ;;  %v920_v45 = vpack.c.bf16 %v689_v43, %v688_v42 }
 0x2fb   :  { %v398_v49 = vmul.f32 1.442695, %v390_v47 }
 0x2fc   :  { %v377_v51 = vpop.xlane.xlu0 %376  ;;  %v402_v56 = vmul.f32 1.442695, %v392_v50 }
 0x2fd   :  { %943 = vpow2.f32 %v398_v49  ;;  %v386_v52 = vpop.xlane.xlu1 %385  ;;  %v393_v55 = vsub.f32 %v872_v28, %v377_v51 }
 0x2fe   :  { %v396_v53 = vsub.f32 %v357_v31, %v386_v52 }
 0x2ff   :  { %v1197_v54 = vpop.eup %937  ;;  %v404_v62 = vmul.f32 1.442695, %v393_v55 }
 0x300   :  { %v410_v57 = vmul.f32 1.442695, %v396_v53  ;;  %v389_v58 = vpop.xlane.xlu0 %388  ;;  %v429_v59 = vsel %vm173_vm1, %v1197_v54, 0.0 }
 0x301   :  { %v397_v60 = vsub.f32 %v880_v29, %v389_v58  ;;  %430 = vadd.xlane.f32.xlu0 %v429_v59 }
 0x302   :  { %945 = vpow2.f32 %v410_v57 }
 0x303   :  { %v940_v61 = vpop.eup %939  ;;  %v412_v63 = vmul.f32 1.442695, %v397_v60  ;;  %947 = vpow2.f32 %v402_v56 }
 0x304   :  { %v942_v0 = vpop.eup %941  ;;  %v426_v1 = vsel %vm173_vm1, %v940_v61, 0.0 }
 0x305   :  { %949 = vpow2.f32 %v412_v63  ;;  %v417_v2 = vsel %vm173_vm1, %v942_v0, 0.0  ;;  %427 = vadd.xlane.f32.xlu1 %v426_v1  ;;  %v819_v1 = vld [vmem:[%s1249_s4] ss:$0 sm:$0xff] }
 0x306   :  { %418 = vadd.xlane.f32.xlu0 %v417_v2  ;;  %951 = vpow2.f32 %v404_v62 }
 0x307   :  { %v944_v3 = vpop.eup %943 }
 0x308   :  { %v414_v4 = vsel %vm173_vm1, %v944_v3, 0.0 }
 0x309   :  { %415 = vadd.xlane.f32.xlu1 %v414_v4 }
 0x30c   :  { %v946_v5 = vpop.eup %945 }
 0x30d   :  { %v432_v6 = vsel %vm173_vm1, %v946_v5, 0.0  ;;  %v948_v7 = vpop.eup %947 }
 0x30e   :  { %433 = vadd.xlane.f32.xlu1 %v432_v6  ;;  %v420_v13 = vsel %vm173_vm1, %v948_v7, 0.0 }
 0x30f   :  { %v950_v8 = vpop.eup %949 }
 0x310   :  { %v435_v9 = vsel %vm173_vm1, %v950_v8, 0.0  ;;  %v952_v11 = vpop.eup %951 }
 0x311   :  { %436 = vadd.xlane.f32.xlu0 %v435_v9  ;;  %v423_v14 = vsel %vm173_vm1, %v952_v11, 0.0 }
 0x312   :  { %421 = vadd.xlane.f32.xlu1 %v420_v13 }
 0x315   :  { %424 = vadd.xlane.f32.xlu0 %v423_v14 }
 0x323   :  { %454 = vrot.lane.b32.xlu1 %v1165_v12, %s1072_s10 }
 0x32b   :  { %554 = vrot.lane.b32.xlu0 %v1163_v10, %s1072_s10 }
 0x38e   :  { %v431_v15 = vpop.xlane.xlu0 %430 }
 0x392   :  { %v428_v16 = vpop.xlane.xlu1 %427 }
 0x393   :  { %v419_v17 = vpop.xlane.xlu0 %418  ;;  %953 = vrcp.f32 %v428_v16 }
 0x394   :  { %955 = vrcp.f32 %v419_v17 }
 0x396   :  { %v416_v18 = vpop.xlane.xlu1 %415 }
 0x397   :  { %957 = vrcp.f32 %v416_v18 }
 0x398   :  { %959 = vrcp.f32 %v431_v15 }
 0x39b   :  { %v434_v19 = vpop.xlane.xlu1 %433 }
 0x39c   :  { %961 = vrcp.f32 %v434_v19 }
 0x39d   :  { %v954_v20 = vpop.eup %953 }
 0x39e   :  { %v437_v21 = vpop.xlane.xlu0 %436  ;;  %v450_v22 = vmul.f32 %v954_v20, %v940_v61  ;;  %v956_v24 = vpop.eup %955 }
 0x39f   :  { %963 = vrcp.f32 %v437_v21  ;;  %v422_v23 = vpop.xlane.xlu1 %421  ;;  %v447_v28 = vmul.f32 %v956_v24, %v942_v0 }
 0x3a0   :  { %965 = vrcp.f32 %v422_v23  ;;  %891 = vmatprep.mubr.msk.f32.mxu0 %vm173_vm1, %v450_v22 }
 0x3a1   :  { %v958_v10 = vpop.eup %957 }
 0x3a2   :  { %v425_v12 = vpop.xlane.xlu0 %424  ;;  %v446_v25 = vmul.f32 %v958_v10, %v944_v3  ;;  %v960_v27 = vpop.eup %959 }
 0x3a3   :  { %967 = vrcp.f32 %v425_v12  ;;  %v455_v26 = vpop.permute.xlu1 %454  ;;  %v451_v31 = vmul.f32 %v960_v27, %v1197_v54 }
 0x3a4   :  { %881 = vmatprep.subr.mxu1 %v455_v26  ;;  %883 = vmatprep.mubr.msk.f32.mxu1 %vm173_vm1, %v446_v25 }
 0x3a5   :  { %882 = vmatpush3.msra.mxu1 %v455_v26 }
 0x3a6   :  { %v962_v29 = vpop.eup %961  ;;  %v555_v30 = vpop.permute.xlu0 %554  ;;  %884 = vmatmul.mubr.msk.f32.vlgmr.msra.gmra.mrb[4].mxu1 %vm173_vm1, %v447_v28  ;;  %917 = vmatprep.subr.bf16.mxu1 %v916_v41 }
 0x3a7   :  { %889 = vmatprep.subr.mxu0 %v555_v30  ;;  %v452_v32 = vmul.f32 %v962_v29, %v946_v5  ;;  %919 = vmatpush3.bf16.msra.mxu1 %v916_v41 }
 0x3a8   :  { %890 = vmatpush3.msra.mxu0 %v555_v30  ;;  %921 = vmatprep.subr.bf16.mxu1 %v920_v45 }
 0x3a9   :  { %v964_v33 = vpop.eup %963  ;;  %892 = vmatmul.mubr.msk.f32.vlgmr.msra.gmra.mrb[6].mxu0 %vm173_vm1, %v451_v31 }
 0x3aa   :  { %v966_v34 = vpop.eup %965  ;;  %894 = vmatprep.mubr.msk.f32.mxu0 %vm173_vm1, %v452_v32  ;;  %v453_v35 = vmul.f32 %v964_v33, %v950_v8 }
 0x3ab   :  { %v448_v36 = vmul.f32 %v966_v34, %v948_v7  ;;  %923 = vmatpush3.bf16.msra.mxu1 %v920_v45 }
 0x3ad   :  { %v968_v37 = vpop.eup %967  ;;  %886 = vmatprep.mubr.msk.f32.mxu1 %vm173_vm1, %v448_v36  ;;  %895 = vmatmul.mubr.msk.f32.gmra.mrb[8].mxu0 %vm173_vm1, %v453_v35 }
 0x3ae   :  { %v449_v38 = vmul.f32 %v968_v37, %v952_v11 }
 0x3b0   :  { %887 = vmatmul.mubr.msk.f32.gmra.mrb[6].mxu1 %vm173_vm1, %v449_v38 }
 0x479   :  { %v885_v44 = vpop.f32.mrb[4].mxu1 }
 0x47a   :  { %v535_v46 = vpop.f32.mrb[5].mxu1 }
 0x47c   :  { %v893_v47 = vpop.f32.mrb[6].mxu0 }
 0x47d   :  { %658 = vrot.lane.b32.xlu1 %v893_v47, %s1066_s6  ;;  %v635_v48 = vpop.f32.mrb[7].mxu0 }
 0x480   :  { %v896_v49 = vpop.f32.mrb[8].mxu0 }
 0x481   :  { %v645_v50 = vpop.f32.mrb[9].mxu0  ;;  %656 = vrot.lane.b32.xlu1 %v885_v44, %s1066_s6 }
 0x483   :  { %v888_v51 = vpop.f32.mrb[6].mxu1 }
 0x484   :  { %v545_v52 = vpop.f32.mrb[7].mxu1 }
 0x485   :  { %666 = vrot.lane.b32.xlu1 %v645_v50, %s1073_s11  ;;  %664 = vrot.lane.b32.xlu0 %v545_v52, %s1073_s11 }
 0x489   :  { %674 = vrot.lane.b32.xlu1 %v896_v49, %s1074_s12  ;;  %672 = vrot.lane.b32.xlu0 %v888_v51, %s1074_s12 }
 0x4ef   :  { %v659_v53 = vpop.permute.xlu1 %658 }
 0x4f0   :  { %v679_v57 = vsel %vm173_vm1, %v635_v48, %v659_v53 }
 0x4f3   :  { %v657_v54 = vpop.permute.xlu1 %656 }
 0x4f4   :  { %v678_v58 = vsel %vm173_vm1, %v535_v46, %v657_v54 }
 0x4f7   :  { %v665_v55 = vpop.permute.xlu0 %664  ;;  %v667_v56 = vpop.permute.xlu1 %666 }
 0x4f8   :  { %v681_v59 = vsel %vm680_vm2, %v678_v58, %v665_v55  ;;  %v682_v60 = vsel %vm680_vm2, %v679_v57, %v667_v56 }
 0x4fb   :  { %v673_v61 = vpop.permute.xlu0 %672  ;;  %v675_v62 = vpop.permute.xlu1 %674 }
 0x4fc   :  { %v684_v63 = vsel %vm683_vm3, %v681_v59, %v673_v61  ;;  %v685_v0 = vsel %vm683_vm3, %v682_v60, %v675_v62 }
 0x4fd   :  { %905 = vmatprep.mubr.msk.f32.mxu1 %vm75_vm0, %v684_v63 }
 0x4fe   :  { %906 = vmatmul.mubr.msk.f32.vlgmr.msra.gmra.mrb[8].mxu1 %vm75_vm0, %v685_v0 }
 0x5d1   :  { %v907_v2 = vpop.f32.mrb[8].mxu1 }
 0x5d2   :  { %v775_v3 = vadd.f32 %v907_v2, %v819_v1  ;;  %v769_v4 = vpop.f32.mrb[9].mxu1 }
 0x5d3   :  { %v770_v5 = vadd.f32 %v819_v1, %v769_v4 }
 0x5d4   :  { %779 = vst.msk [vmem:[#allocation8 + $0x8] sm:$0xff] %vm75_vm0, %v775_v3 }
 0x5d5   :  { %778 = vst.msk [vmem:[#allocation8] sm:$0xff] %vm75_vm0, %v770_v5 }
 0x5d6   :  { %1046 = shalt.err (!%p1043_p0)
}
 0x5d7   :  { %s1047_s18 = scalar_lea.hbm %s1250_s5, 256 }
 0x5d8   :  { %p1048_p1 = scmp.ne.s32.totalorder %s1250_s5, %s1047_s18  ;;  %p1051_p2 = scmp.lt.u32.totalorder %s1047_s18, %s1250_s5 }
 0x5da   :  { %p1053_p3 = pnand %p1051_p2, %p1048_p1 }
 0x5dc   :  { %1056 = shalt.err (!%p1053_p3)
}
 0x5dd   :  { %791 = dma.vmem_to_hbm [thread:$0]  %s786_s16, 256, %s1250_s5, [#allocation4], %s1065_s30, %s1065_s30, %s1066_s6  }
 0x5de   :  { %1061 = dma.done.wait [#allocation4], 256  }
 0x5df   :  { %1062 = vsyncadd [#allocation4], 4294967040 }
 0x5e0   :  { %795 = vsyncpa [#allocation3], 1 }
 0x5e1   :  { %796 = vsyncpa [#allocation6], 1 }
 0x5e2   :  { %797 = vsyncpa [#allocation4], 1 }

</bundles_post_ra>
